<compile_context>
chip_gen: v7x
topology: tpu7x:2x2x1
jax: 0.10.0
libtpu: 0.0.40
codegen_flags: <defaults>
</compile_context>

<pallas_src>
import functools

import jax
import jax.numpy as jnp
import numpy as np
from jax.experimental import pallas as pl
from jax.experimental.pallas import tpu as pltpu

SEQ_LEN = 60                 # Model_Ensemble forces seq_len = 60
SEQ_PAD = 64                 # 60 -> 64: 8-aligned sublane / MXU contraction dim
PRED_LEN = 24                # forecast horizon of the synthetic heads
EPS = 1e-5
LANE = 128
X_ROWS = SEQ_PAD + PRED_LEN  # 88 = 64 x rows + 24 precomputed x_mark rows
MEAN_ROW = 2 * PRED_LEN      # row index of the 1/60-ones row in w_big
W_ROWS = 2 * PRED_LEN + 8    # 56: [W1 | W2 | mean row | zero pad], 8-aligned
N_TILE_MAX = 8192            # lane tile cap (safe on v5e/v6e/v7x VMEM)


def _ensemble_kernel(x_ref, w_ref, aux_ref, out_ref, *, w_ens1, w_ens2):
    """Lane-dense ensemble forecaster (one lane tile per grid step).

    x_ref   : (88, NT)  rows [0:64)  = x laid out as (time, batch*feat)
                        rows [64:88) = WM @ sum_f(x_mark), broadcast over feat
    w_ref   : (56, 64)  stacked [W1 ; W2 ; (1/60)-ones mean row ; zeros]
    aux_ref : (3, 24, 1)  [b1, b2, rowsum(W2)]
    out_ref : (3, 24, NT) [ensemble, y1, y2]
    """
    xb = x_ref[...]                                   # (88, NT)
    x = xb[:SEQ_PAD]                                  # (64, NT) raw window
    zm = xb[SEQ_PAD:]                                 # (24, NT) x_mark term

    # Single fused MXU matmul: [W1@x ; W2@x ; mean(x)] in one (56,64)@(64,NT).
    z = jnp.dot(w_ref[...], x, preferred_element_type=jnp.float32)  # (56, NT)
    z1 = z[:PRED_LEN]                                 # backbone linear part
    z2 = z[PRED_LEN:MEAN_ROW]                         # FSNet-head linear part
    mean = z[MEAN_ROW:MEAN_ROW + 1]                   # (1, NT) RevIN mean

    b1 = aux_ref[0]                                   # (24, 1)
    b2 = aux_ref[1]
    rs2 = aux_ref[2]                                  # rowsum(W2)

    # Two-pass centered variance over the 60 real time steps.  The 4 zero-pad
    # rows each contribute (0-mean)^2 = mean^2; subtract that exactly.
    d = x - mean
    ssq = jnp.sum(d * d, axis=0, keepdims=True)                       # (1, NT)
    ssq = ssq - float(SEQ_PAD - SEQ_LEN) * (mean * mean)
    var = jnp.maximum(ssq * (1.0 / SEQ_LEN), 0.0)
    inv_std = jax.lax.rsqrt(var + EPS)                # single EUP push
    std = (var + EPS) * inv_std                       # == sqrt(var+EPS), VPU mul

    # encoder_time (backbone stand-in): linear time-mix + time-mark term + bias
    y1 = z1 + zm + b1
    # encoder (FSNet stand-in): W2 @ xn == (W2 @ x - rowsum(W2)*mean) * inv_std
    y2 = ((z2 - rs2 * mean) * inv_std + b2) * std + mean

    out_ref[0] = (w_ens1 * y1 + w_ens2 * y2).astype(out_ref.dtype)
    out_ref[1] = y1.astype(out_ref.dtype)
    out_ref[2] = y2.astype(out_ref.dtype)


def _pad_or_truncate(a, target_len):
    b, l, f = a.shape
    if l < target_len:
        pad = jnp.zeros((b, target_len - l, f), a.dtype)
        return jnp.concatenate([pad, a], axis=1)
    if l > target_len:
        return a[:, -target_len:, :]
    return a


def _round_up(n, m):
    return ((n + m - 1) // m) * m


def _cdiv(a, b):
    return -(-a // b)


@functools.partial(jax.jit, static_argnames=("w1", "w2"))
def model_ensemble_forward(x, x_mark, params, w1=0.5, w2=0.5):
    """Pallas implementation of Model_Ensemble.forward.

    x      : (B, L, F)  float32
    x_mark : (B, L, Fm) float32
    returns (y, y1, y2) each of shape (B, PRED_LEN, F).
    """
    # Glue: pad-with-zeros / truncate to the fixed 60-step window (as in
    # forward_individual).  x_mark is padded the same way.
    x = _pad_or_truncate(x.astype(jnp.float32), SEQ_LEN)
    x_mark = _pad_or_truncate(x_mark.astype(jnp.float32), SEQ_LEN)

    B, _, F = x.shape
    N = B * F

    # ---- lane-dense layout: (time, batch*feature), time padded 60 -> 64
    xp = jnp.pad(x, ((0, 0), (0, SEQ_PAD - SEQ_LEN), (0, 0)))       # (B,64,F)
    X = xp.transpose(1, 0, 2).reshape(SEQ_PAD, N)                   # (64, N)

    # Pre-compute the (tiny) x_mark contribution in the wrapper instead of
    # shipping a 64-row broadcast of x_mark through the kernel.
    xm_sum = jnp.sum(x_mark, axis=-1)                               # (B, 60)
    zm = jnp.einsum("ps,bs->pb", params["wm"], xm_sum)              # (24, B)
    ZM = jnp.broadcast_to(zm[:, :, None],
                          (PRED_LEN, B, F)).reshape(PRED_LEN, N)    # (24, N)

    x_big = jnp.concatenate([X, ZM], axis=0)                        # (88, N)

    # ---- lane tiling: big tiles (amortize per-step overhead), but always
    # >=2 grid steps when possible so both v7x TensorCores are used.
    n128 = _round_up(N, LANE)
    if n128 >= 2 * LANE:
        g = max(2, _cdiv(n128, N_TILE_MAX))
    else:
        g = 1
    n_tile = min(N_TILE_MAX, _round_up(_cdiv(n128, g), LANE))
    n_pad = g * n_tile
    x_big = jnp.pad(x_big, ((0, 0), (0, n_pad - N)))

    # stacked weights (56, 64): [W1 ; W2 ; mean row ; zeros], time padded to 64
    def pad_w(w):
        return jnp.pad(w, ((0, 0), (0, SEQ_PAD - SEQ_LEN)))

    mean_row = jnp.pad(jnp.full((1, SEQ_LEN), 1.0 / SEQ_LEN, jnp.float32),
                       ((0, 0), (0, SEQ_PAD - SEQ_LEN)))
    w_big = jnp.concatenate(
        [pad_w(params["w1"]), pad_w(params["w2"]), mean_row,
         jnp.zeros((W_ROWS - MEAN_ROW - 1, SEQ_PAD), jnp.float32)],
        axis=0)                                                     # (56, 64)

    rs2 = jnp.sum(params["w2"], axis=1, keepdims=True)              # (24, 1)
    aux = jnp.stack([params["b1"], params["b2"], rs2], axis=0)      # (3, 24, 1)

    kernel = functools.partial(_ensemble_kernel,
                               w_ens1=float(w1), w_ens2=float(w2))

    cost = pl.CostEstimate(
        flops=int(2 * W_ROWS * SEQ_PAD * n_pad + 10 * SEQ_PAD * n_pad),
        transcendentals=int(n_pad),
        bytes_accessed=int(4 * (X_ROWS * n_pad + 3 * PRED_LEN * n_pad
                                + W_ROWS * SEQ_PAD + 3 * PRED_LEN)))

    out = pl.pallas_call(
        kernel,
        out_shape=jax.ShapeDtypeStruct((3, PRED_LEN, n_pad), jnp.float32),
        grid_spec=pltpu.PrefetchScalarGridSpec(
            num_scalar_prefetch=0,
            grid=(g,),
            in_specs=[
                pl.BlockSpec((X_ROWS, n_tile), lambda n: (0, n)),     # x_big
                pl.BlockSpec((W_ROWS, SEQ_PAD), lambda n: (0, 0)),    # w_big
                pl.BlockSpec((3, PRED_LEN, 1), lambda n: (0, 0, 0)),  # aux
            ],
            out_specs=pl.BlockSpec((3, PRED_LEN, n_tile), lambda n: (0, 0, n)),
        ),
        compiler_params=pltpu.CompilerParams(
            dimension_semantics=("parallel",),
            vmem_limit_bytes=48 << 20),
        cost_estimate=cost,
    )(x_big, w_big, aux)

    # TODO(synk): the (PRED_LEN,B,F)->(B,PRED_LEN,F) transposes below are an
    # extra HBM pass; skip them if callers can consume the (PRED_LEN,B,F) slab.
    def unpack(row):
        y = out[row, :, :N].reshape(PRED_LEN, B, F)
        return y.transpose(1, 0, 2)                                 # (B, 24, F)

    return unpack(0), unpack(1), unpack(2)


def init_params(key):
    """Deterministic synthetic parameters for the two forecaster heads."""
    k1, k2, k3, k4, k5 = jax.random.split(key, 5)
    scale = 1.0 / np.sqrt(SEQ_LEN)
    return {
        "w1": jax.random.normal(k1, (PRED_LEN, SEQ_LEN), jnp.float32) * scale,
        "wm": jax.random.normal(k2, (PRED_LEN, SEQ_LEN), jnp.float32) * (0.1 * scale),
        "b1": jax.random.normal(k3, (PRED_LEN, 1), jnp.float32) * 0.01,
        "w2": jax.random.normal(k4, (PRED_LEN, SEQ_LEN), jnp.float32) * scale,
        "b2": jax.random.normal(k5, (PRED_LEN, 1), jnp.float32) * 0.01,
    }


def _reference_forward(x, x_mark, params, w1=0.5, w2=0.5):
    """Pure-JAX reference for correctness checking."""
    x = _pad_or_truncate(x.astype(jnp.float32), SEQ_LEN)
    x_mark = _pad_or_truncate(x_mark.astype(jnp.float32), SEQ_LEN)
    y1 = (jnp.einsum("ps,bsf->bpf", params["w1"], x)
          + jnp.sum(jnp.einsum("ps,bsf->bpf", params["wm"], x_mark),
                    axis=-1, keepdims=True)
          + params["b1"][None])
    mean = jnp.mean(x, axis=1, keepdims=True)
    var = jnp.mean((x - mean) ** 2, axis=1, keepdims=True)
    xn = (x - mean) * jax.lax.rsqrt(var + EPS)
    y2 = (jnp.einsum("ps,bsf->bpf", params["w2"], xn) + params["b2"][None]) \
         * jnp.sqrt(var + EPS) + mean
    return w1 * y1 + w2 * y2, y1, y2


def _check(x, x_mark, params):
    y, y1, y2 = model_ensemble_forward(x, x_mark, params, w1=0.5, w2=0.5)
    jax.block_until_ready((y, y1, y2))
    yr, y1r, y2r = _reference_forward(x, x_mark, params, w1=0.5, w2=0.5)
    np.testing.assert_allclose(np.asarray(y1), np.asarray(y1r), rtol=1e-4, atol=1e-4)
    np.testing.assert_allclose(np.asarray(y2), np.asarray(y2r), rtol=1e-4, atol=1e-4)
    np.testing.assert_allclose(np.asarray(y), np.asarray(yr), rtol=1e-4, atol=1e-4)


if __name__ == "__main__":
    key = jax.random.PRNGKey(0)
    kx, km, kp, kx2, km2, kx3, km3 = jax.random.split(key, 7)
    params = init_params(kp)

    # short sequence -> exercises the zero-padding branch (single-tile grid)
    B, L, F, Fm = 2, 48, 4, 4
    x = jax.random.normal(kx, (B, L, F), jnp.float32)
    x_mark = jax.random.normal(km, (B, L, Fm), jnp.float32)
    _check(x, x_mark, params)

    # long sequence -> exercises the truncation branch
    x2 = jax.random.normal(kx2, (B, 72, F), jnp.float32)
    xm2 = jax.random.normal(km2, (B, 72, Fm), jnp.float32)
    _check(x2, xm2, params)

    # medium, non-aligned B*F -> exercises the >=2-step grid + lane padding
    x3 = jax.random.normal(kx3, (7, 60, 37), jnp.float32) + 5.0   # nonzero mean
    xm3 = jax.random.normal(km3, (7, 60, 5), jnp.float32)
    _check(x3, xm3, params)

    print("KERNEL_OK")
</pallas_src>

<mosaic_0001>
module attributes {stable_mosaic.version = 11 : i64} {
  func.func @_ensemble_kernel(%arg0: i32, %arg1: memref<88x128xf32, #tpu.memory_space<vmem>>, %arg2: memref<56x64xf32, #tpu.memory_space<vmem>>, %arg3: memref<3x24x1xf32, #tpu.memory_space<vmem>>, %arg4: memref<3x24x128xf32, #tpu.memory_space<vmem>>) attributes {dimension_semantics = [#tpu.dimension_semantics<parallel>], iteration_bounds = array<i64: 1>, scalar_prefetch = 0 : i64, scratch_operands = 0 : i64, tpu.core_type = #tpu.core_type<tc>, window_params = [{transform_indices = @transform_0, window_bounds = array<i64: 88, 128>}, {pipeline_mode = #tpu.pipeline_mode<synchronous>, transform_indices = @transform_1, window_bounds = array<i64: 56, 64>}, {pipeline_mode = #tpu.pipeline_mode<synchronous>, transform_indices = @transform_2, window_bounds = array<i64: 3, 24, 1>}, {transform_indices = @transform_3, window_bounds = array<i64: 3, 24, 128>}]} {
    %c0 = arith.constant 0 : index
    %c0_0 = arith.constant 0 : index
    %0 = vector.load %arg1[%c0, %c0_0] : memref<88x128xf32, #tpu.memory_space<vmem>>, vector<88x128xf32>
    %1 = vector.extract_strided_slice %0 {offsets = [0, 0], sizes = [64, 128], strides = [1, 1]} : vector<88x128xf32> to vector<64x128xf32>
    %2 = vector.extract_strided_slice %0 {offsets = [64, 0], sizes = [24, 128], strides = [1, 1]} : vector<88x128xf32> to vector<24x128xf32>
    %c0_1 = arith.constant 0 : index
    %c0_2 = arith.constant 0 : index
    %3 = vector.load %arg2[%c0_1, %c0_2] : memref<56x64xf32, #tpu.memory_space<vmem>>, vector<56x64xf32>
    %cst = arith.constant dense<0.000000e+00> : vector<56x128xf32>
    %4 = tpu.matmul %3, %1, %cst {dimension_numbers = #tpu.dot_dimension_numbers<[1], [0], [0], [1], [0, 0, 1, 1], [], []>} : vector<56x64xf32>, vector<64x128xf32>, vector<56x128xf32> -> vector<56x128xf32>
    %5 = vector.extract_strided_slice %4 {offsets = [0, 0], sizes = [24, 128], strides = [1, 1]} : vector<56x128xf32> to vector<24x128xf32>
    %6 = vector.extract_strided_slice %4 {offsets = [24, 0], sizes = [24, 128], strides = [1, 1]} : vector<56x128xf32> to vector<24x128xf32>
    %7 = vector.extract_strided_slice %4 {offsets = [48, 0], sizes = [1, 128], strides = [1, 1]} : vector<56x128xf32> to vector<1x128xf32>
    %c0_3 = arith.constant 0 : index
    %c0_4 = arith.constant 0 : index
    %c0_5 = arith.constant 0 : index
    %8 = vector.load %arg3[%c0_3, %c0_4, %c0_5] : memref<3x24x1xf32, #tpu.memory_space<vmem>>, vector<1x24x1xf32>
    %9 = vector.shape_cast %8 : vector<1x24x1xf32> to vector<24x1xf32>
    %c1 = arith.constant 1 : index
    %c0_6 = arith.constant 0 : index
    %c0_7 = arith.constant 0 : index
    %10 = vector.load %arg3[%c1, %c0_6, %c0_7] : memref<3x24x1xf32, #tpu.memory_space<vmem>>, vector<1x24x1xf32>
    %11 = vector.shape_cast %10 : vector<1x24x1xf32> to vector<24x1xf32>
    %c2 = arith.constant 2 : index
    %c0_8 = arith.constant 0 : index
    %c0_9 = arith.constant 0 : index
    %12 = vector.load %arg3[%c2, %c0_8, %c0_9] : memref<3x24x1xf32, #tpu.memory_space<vmem>>, vector<1x24x1xf32>
    %13 = vector.shape_cast %12 : vector<1x24x1xf32> to vector<24x1xf32>
    %14 = vector.broadcast %7 : vector<1x128xf32> to vector<64x128xf32>
    %15 = arith.subf %1, %14 : vector<64x128xf32>
    %16 = arith.mulf %15, %15 : vector<64x128xf32>
    %cst_10 = arith.constant dense<0.000000e+00> : vector<128xf32>
    %17 = vector.multi_reduction <add>, %16, %cst_10 [0] : vector<64x128xf32> to vector<128xf32>
    %18 = vector.shape_cast %17 : vector<128xf32> to vector<1x128xf32>
    %19 = arith.mulf %7, %7 : vector<1x128xf32>
    %cst_11 = arith.constant 4.000000e+00 : f32
    %20 = vector.broadcast %cst_11 : f32 to vector<1x128xf32>
    %21 = arith.mulf %20, %19 : vector<1x128xf32>
    %22 = arith.subf %18, %21 : vector<1x128xf32>
    %cst_12 = arith.constant 0.0166666675 : f32
    %23 = vector.broadcast %cst_12 : f32 to vector<1x128xf32>
    %24 = arith.mulf %22, %23 : vector<1x128xf32>
    %cst_13 = arith.constant 0.000000e+00 : f32
    %25 = vector.broadcast %cst_13 : f32 to vector<1x128xf32>
    %26 = arith.maximumf %24, %25 : vector<1x128xf32>
    %cst_14 = arith.constant 9.99999974E-6 : f32
    %27 = vector.broadcast %cst_14 : f32 to vector<1x128xf32>
    %28 = arith.addf %26, %27 : vector<1x128xf32>
    %29 = math.rsqrt %28 : vector<1x128xf32>
    %cst_15 = arith.constant 9.99999974E-6 : f32
    %30 = vector.broadcast %cst_15 : f32 to vector<1x128xf32>
    %31 = arith.addf %26, %30 : vector<1x128xf32>
    %32 = arith.mulf %31, %29 : vector<1x128xf32>
    %33 = arith.addf %5, %2 : vector<24x128xf32>
    %34 = vector.broadcast %9 : vector<24x1xf32> to vector<24x128xf32>
    %35 = arith.addf %33, %34 : vector<24x128xf32>
    %36 = vector.broadcast %13 : vector<24x1xf32> to vector<24x128xf32>
    %37 = vector.broadcast %7 : vector<1x128xf32> to vector<24x128xf32>
    %38 = arith.mulf %36, %37 : vector<24x128xf32>
    %39 = arith.subf %6, %38 : vector<24x128xf32>
    %40 = vector.broadcast %29 : vector<1x128xf32> to vector<24x128xf32>
    %41 = arith.mulf %39, %40 : vector<24x128xf32>
    %42 = vector.broadcast %11 : vector<24x1xf32> to vector<24x128xf32>
    %43 = arith.addf %41, %42 : vector<24x128xf32>
    %44 = vector.broadcast %32 : vector<1x128xf32> to vector<24x128xf32>
    %45 = arith.mulf %43, %44 : vector<24x128xf32>
    %46 = vector.broadcast %7 : vector<1x128xf32> to vector<24x128xf32>
    %47 = arith.addf %45, %46 : vector<24x128xf32>
    %cst_16 = arith.constant 5.000000e-01 : f32
    %48 = vector.broadcast %cst_16 : f32 to vector<24x128xf32>
    %49 = arith.mulf %48, %35 : vector<24x128xf32>
    %cst_17 = arith.constant 5.000000e-01 : f32
    %50 = vector.broadcast %cst_17 : f32 to vector<24x128xf32>
    %51 = arith.mulf %50, %47 : vector<24x128xf32>
    %52 = arith.addf %49, %51 : vector<24x128xf32>
    %c0_18 = arith.constant 0 : index
    %c0_19 = arith.constant 0 : index
    %c0_20 = arith.constant 0 : index
    %53 = vector.load %arg4[%c0_18, %c0_19, %c0_20] : memref<3x24x128xf32, #tpu.memory_space<vmem>>, vector<1x24x128xf32>
    %54 = vector.shape_cast %53 : vector<1x24x128xf32> to vector<24x128xf32>
    %55 = vector.shape_cast %52 : vector<24x128xf32> to vector<1x24x128xf32>
    tpu.vector_store %arg4[%c0_18, %c0_19, %c0_20], %55 {strides = array<i32>} : memref<3x24x128xf32, #tpu.memory_space<vmem>>, vector<1x24x128xf32>,
    %c1_21 = arith.constant 1 : index
    %c0_22 = arith.constant 0 : index
    %c0_23 = arith.constant 0 : index
    %56 = vector.load %arg4[%c1_21, %c0_22, %c0_23] : memref<3x24x128xf32, #tpu.memory_space<vmem>>, vector<1x24x128xf32>
    %57 = vector.shape_cast %56 : vector<1x24x128xf32> to vector<24x128xf32>
    %58 = vector.shape_cast %35 : vector<24x128xf32> to vector<1x24x128xf32>
    tpu.vector_store %arg4[%c1_21, %c0_22, %c0_23], %58 {strides = array<i32>} : memref<3x24x128xf32, #tpu.memory_space<vmem>>, vector<1x24x128xf32>,
    %c2_24 = arith.constant 2 : index
    %c0_25 = arith.constant 0 : index
    %c0_26 = arith.constant 0 : index
    %59 = vector.load %arg4[%c2_24, %c0_25, %c0_26] : memref<3x24x128xf32, #tpu.memory_space<vmem>>, vector<1x24x128xf32>
    %60 = vector.shape_cast %59 : vector<1x24x128xf32> to vector<24x128xf32>
    %61 = vector.shape_cast %47 : vector<24x128xf32> to vector<1x24x128xf32>
    tpu.vector_store %arg4[%c2_24, %c0_25, %c0_26], %61 {strides = array<i32>} : memref<3x24x128xf32, #tpu.memory_space<vmem>>, vector<1x24x128xf32>,
    return
  }
  func.func @transform_0(%arg0: i32) -> (i32, i32) {
    %c0_i32 = arith.constant 0 : i32
    %c0_i32_0 = arith.constant 0 : i32
    return %c0_i32, %arg0 : i32, i32
  }
  func.func @transform_1(%arg0: i32) -> (i32, i32) {
    %c0_i32 = arith.constant 0 : i32
    %c0_i32_0 = arith.constant 0 : i32
    %c0_i32_1 = arith.constant 0 : i32
    return %c0_i32, %c0_i32_0 : i32, i32
  }
  func.func @transform_2(%arg0: i32) -> (i32, i32, i32) {
    %c0_i32 = arith.constant 0 : i32
    %c0_i32_0 = arith.constant 0 : i32
    %c0_i32_1 = arith.constant 0 : i32
    %c0_i32_2 = arith.constant 0 : i32
    return %c0_i32, %c0_i32_0, %c0_i32_1 : i32, i32, i32
  }
  func.func @transform_3(%arg0: i32) -> (i32, i32, i32) {
    %c0_i32 = arith.constant 0 : i32
    %c0_i32_0 = arith.constant 0 : i32
    %c0_i32_1 = arith.constant 0 : i32
    return %c0_i32, %c0_i32_0, %arg0 : i32, i32, i32
  }
}

</mosaic_0001>

<bundles_post_ra>
// kernel: model_ensemble_forward.1
= control target key start
LH: loop header
LB: loop body
LE: loop exit
PB: predicated region body
PF: predicated region fallthrough
CT: control target
= control target key end

     0   :  { %v406_v0 = vmov 0.0|0.0   ;;  %vm407_vm0 = vmmov 0   ;;  %v408_v6 = vmov 0.0   ;;  %v409_v7 = vmov 0   ;;  %s635_s0 = inlined_call_operand.vmem [shape: f32[88,128], index: 0, kind: input, shape index: {}]   ;;  %s636_s2 = inlined_call_operand.vmem [shape: f32[3,24,1], index: 2, kind: input, shape index: {}]   ;;  %s637_s1 = inlined_call_operand.vmem [shape: f32[56,64], index: 1, kind: input, shape index: {}]   ;;  %s638_s3 = inlined_call_operand.vmem [shape: f32[3,24,128], index: 3, kind: output, shape index: {}]  }
   0x1   :  { %378 = vmatprep.subr.bf16.mxu0 %v406_v0  ;;  %390 = vmatprep.subr.bf16.mxu1 %v406_v0  ;;  %v433_v1 = vld [vmem:[%s635_s0] sm:$0xff]  ;;  %v438_v2 = vld [vmem:[%s635_s0 + $0x8] sm:$0xff]  ;;  %v443_v3 = vld [vmem:[%s635_s0 + $0x10] sm:$0xff]  ;;  %vm32_vm1 = vcmask 523264   ;;  %v165_v36 = vlaneseq }
   0x2   :  { %v379_v4 = vpack.c.bf16 %v438_v2, %v433_v1  ;;  %v450_v5 = vld [vmem:[%s635_s0 + $0x18] sm:$0xff]  ;;  %357 = vmatprep.mubr.msk.f32.mxu0 %vm407_vm0, %v408_v6  ;;  %369 = vmatprep.mubr.msk.f32.mxu1 %vm407_vm0, %v408_v6  ;;  %v461_v9 = vld [vmem:[%s635_s0 + $0x20] sm:$0xff]  ;;  %v466_v10 = vld [vmem:[%s635_s0 + $0x28] sm:$0xff] }
   0x3   :  { %402 = vset.pattern.permute.xlu0 %v409_v7  ;;  %403 = vset.pattern.permute.xlu1 %v409_v7  ;;  %v382_v8 = vpack.c.bf16 %v450_v5, %v443_v3  ;;  %v317_v11 = vld [vmem:[%s636_s2 + $0x30] sm:$0xff]  ;;  %v319_v12 = vld [vmem:[%s636_s2 + $0x40] sm:$0xff]  ;;  %v385_v13 = vpack.c.bf16 %v466_v10, %v461_v9  ;;  %v318_v14 = vld [vmem:[%s636_s2 + $0x38] sm:$0xff]  ;;  %v166_v44 = vshrl.u32 %v165_v36, 7 }
   0x4   :  { %380 = vmatpush3.bf16.msra.mxu0 %v379_v4  ;;  %394 = vmatpush3.bf16.msra.mxu1 %v379_v4  ;;  %v314_v15 = vld [vmem:[%s636_s2 + $0x18] sm:$0xff]  ;;  %v485_v16 = vld [vmem:[%s635_s0 + $0x30] sm:$0xff]  ;;  %v315_v19 = vld [vmem:[%s636_s2 + $0x20] sm:$0xff] }
   0x5   :  { %381 = vmatprep.subr.bf16.mxu0 %v406_v0  ;;  %391 = vmatprep.subr.bf16.mxu1 %v406_v0  ;;  %v490_v17 = vld [vmem:[%s635_s0 + $0x38] sm:$0xff]  ;;  %v316_v20 = vld [vmem:[%s636_s2 + $0x28] sm:$0xff]  ;;  %v25_v21 = vld [vmem:[%s637_s1] sm:$0xff]  ;;  %v565_v53 = vsub.s32 0, %v166_v44 }
   0x6   :  { %229 = vperm.xlu0 %402, %v317_v11   ;;  %239 = vperm.xlu1 %403, %v319_v12   ;;  %v388_v18 = vpack.c.bf16 %v490_v17, %v485_v16  ;;  %v29_v22 = vld [vmem:[%s637_s1 + $0x20] sm:$0xff]  ;;  %v155_v24 = vld [vmem:[%s636_s2 + $0x8] sm:$0xff]  ;;  %v156_v27 = vld [vmem:[%s636_s2 + $0x10] sm:$0xff] }
   0x7   :  { %v154_v23 = vld [vmem:[%s636_s2] sm:$0xff]  ;;  %v26_v25 = vld [vmem:[%s637_s1 + $0x8] sm:$0xff]  ;;  %v27_v28 = vld [vmem:[%s637_s1 + $0x10] sm:$0xff] }
   0x8   :  { %383 = vmatpush3.bf16.msra.mxu0 %v382_v8  ;;  %395 = vmatpush3.bf16.msra.mxu1 %v382_v8  ;;  %v30_v26 = vld [vmem:[%s637_s1 + $0x28] sm:$0xff]  ;;  %v31_v29 = vld [vmem:[%s637_s1 + $0x30] sm:$0xff]  ;;  %v28_v30 = vld [vmem:[%s637_s1 + $0x18] sm:$0xff] }
   0x9   :  { %384 = vmatprep.subr.bf16.mxu0 %v406_v0  ;;  %392 = vmatprep.subr.bf16.mxu1 %v406_v0  ;;  %v22_v38 = vld [vmem:[%s635_s0 + $0x40] sm:$0xff]  ;;  %v23_v45 = vld [vmem:[%s635_s0 + $0x48] sm:$0xff]  ;;  %v24_v60 = vld [vmem:[%s635_s0 + $0x50] sm:$0xff] }
   0xa   :  { %234 = vperm.xlu0 %402, %v318_v14   ;;  %257 = vperm.xlu1 %403, %v314_v15  }
   0xc   :  { %386 = vmatpush3.bf16.msra.mxu0 %v385_v13  ;;  %396 = vmatpush3.bf16.msra.mxu1 %v385_v13 }
   0xd   :  { %387 = vmatprep.subr.bf16.mxu0 %v406_v0  ;;  %393 = vmatprep.subr.bf16.mxu1 %v406_v0 }
   0xe   :  { %262 = vperm.xlu0 %402, %v315_v19   ;;  %267 = vperm.xlu1 %403, %v316_v20  }
  0x10   :  { %389 = vmatpush3.bf16.msra.mxu0 %v388_v18  ;;  %397 = vmatpush3.bf16.msra.mxu1 %v388_v18 }
  0x12   :  { %211 = vperm.xlu0 %402, %v154_v23   ;;  %216 = vperm.xlu1 %403, %v155_v24  }
  0x13   :  { %358 = vmatmul.mubr.msk.f32.vlgmr.msra.gmra.mrb[0].mxu0 %vm32_vm1, %v25_v21  ;;  %370 = vmatmul.mubr.msk.f32.vlgmr.msra.gmra.mrb[0].mxu1 %vm32_vm1, %v29_v22 }
  0x14   :  { %360 = vmatprep.mubr.msk.f32.mxu0 %vm407_vm0, %v408_v6  ;;  %372 = vmatprep.mubr.msk.f32.mxu1 %vm407_vm0, %v408_v6 }
  0x16   :  { %221 = vperm.xlu0 %402, %v156_v27  }
  0x17   :  { %361 = vmatmul.mubr.msk.f32.gmra.mrb[2].mxu0 %vm32_vm1, %v26_v25  ;;  %373 = vmatmul.mubr.msk.f32.gmra.mrb[2].mxu1 %vm32_vm1, %v30_v26 }
  0x18   :  { %363 = vmatprep.mubr.msk.f32.mxu0 %vm407_vm0, %v408_v6  ;;  %375 = vmatprep.mubr.msk.f32.mxu1 %vm407_vm0, %v408_v6 }
  0x1b   :  { %364 = vmatmul.mubr.msk.f32.gmra.mrb[4].mxu0 %vm32_vm1, %v27_v28  ;;  %376 = vmatmul.mubr.msk.f32.gmra.mrb[4].mxu1 %vm32_vm1, %v31_v29 }
  0x1c   :  { %366 = vmatprep.mubr.msk.f32.mxu0 %vm407_vm0, %v408_v6 }
  0x1f   :  { %367 = vmatmul.mubr.msk.f32.gmra.mrb[6].mxu0 %vm32_vm1, %v28_v30 }
  0x85   :  { %v230_v31 = vpop.permute.xlu0 %229  ;;  %v240_v32 = vpop.permute.xlu1 %239 }
  0x89   :  { %v547_v33 = vpop.permute.xlu1 %257  ;;  %v235_v34 = vpop.permute.xlu0 %234 }
  0x8d   :  { %v549_v35 = vpop.permute.xlu0 %262  ;;  %v551_v37 = vpop.permute.xlu1 %267 }
  0x91   :  { %v212_v46 = vpop.permute.xlu0 %211  ;;  %v217_v48 = vpop.permute.xlu1 %216 }
  0x95   :  { %v222_v12 = vpop.permute.xlu0 %221 }
  0xe6   :  { %v556_v39 = vpop.f32.mrb[0].mxu1  ;;  %v120_v40 = vpop.f32.mrb[0].mxu0 }
  0xe7   :  { %v371_v41 = vpop.f32.mrb[1].mxu1  ;;  %v206_v42 = vadd.f32 %v120_v40, %v22_v38  ;;  %v359_v43 = vpop.f32.mrb[1].mxu0 }
  0xe9   :  { %v561_v47 = vadd.f32 %v212_v46, %v206_v42 }
  0xea   :  { %v563_v49 = vpop.f32.mrb[2].mxu1  ;;  %v125_v50 = vpop.f32.mrb[2].mxu0 }
  0xeb   :  { %v374_v51 = vpop.f32.mrb[3].mxu1  ;;  %v207_v52 = vadd.f32 %v125_v50, %v23_v45  ;;  %v362_v54 = vpop.f32.mrb[3].mxu0  ;;  %320 = vst [vmem:[%s638_s3 + $0x18] sm:$0xff] %v561_v47 }
  0xed   :  { %v571_v55 = vadd.f32 %v217_v48, %v207_v52 }
  0xee   :  { %v150_v56 = vpop.f32.mrb[4].mxu1  ;;  %v130_v57 = vpop.f32.mrb[4].mxu0 }
  0xef   :  { %v574_v58 = vrot.slane %v150_v56, %v565_v53  ;;  %v377_v59 = vpop.f32.mrb[5].mxu1  ;;  %v365_v61 = vpop.f32.mrb[5].mxu0  ;;  %321 = vst [vmem:[%s638_s3 + $0x20] sm:$0xff] %v571_v55  ;;  %v208_v4 = vadd.f32 %v130_v57, %v24_v60  ;;  %v198_v41 = vmul.f32 %v150_v56, %v150_v56 }
  0xf1   :  { %v169_v62 = vsub.f32 %v433_v1, %v574_v58  ;;  %v170_v63 = vsub.f32 %v438_v2, %v574_v58  ;;  %v171_v0 = vsub.f32 %v443_v3, %v574_v58  ;;  %v172_v7 = vsub.f32 %v450_v5, %v574_v58 }
  0xf2   :  { %v135_v6 = vpop.f32.mrb[6].mxu0  ;;  %v173_v14 = vsub.f32 %v461_v9, %v574_v58  ;;  %v244_v18 = vmul.f32 %v240_v32, %v574_v58  ;;  %v243_v2 = vmul.f32 %v235_v34, %v574_v58  ;;  %v174_v3 = vsub.f32 %v466_v10, %v574_v58 }
  0xf3   :  { %v177_v8 = vmul.f32 %v169_v62, %v169_v62  ;;  %v178_v11 = vmul.f32 %v170_v63, %v170_v63  ;;  %v368_v13 = vpop.f32.mrb[7].mxu0  ;;  %v179_v15 = vmul.f32 %v171_v0, %v171_v0  ;;  %v242_v19 = vmul.f32 %v230_v31, %v574_v58 }
  0xf4   :  { %v226_v20 = vadd.f32 %v222_v12, %v208_v4  ;;  %v180_v5 = vmul.f32 %v172_v7, %v172_v7  ;;  %v247_v22 = vsub.f32 %v563_v49, %v244_v18  ;;  %v246_v23 = vsub.f32 %v556_v39, %v243_v2 }
  0xf5   :  { %v185_v1 = vadd.f32 %v178_v11, %v177_v8  ;;  %v245_v24 = vsub.f32 %v135_v6, %v242_v19  ;;  %v175_v9 = vsub.f32 %v485_v16, %v574_v58  ;;  %v181_v25 = vmul.f32 %v173_v14, %v173_v14 }
  0xf6   :  { %322 = vst [vmem:[%s638_s3 + $0x28] sm:$0xff] %v226_v20  ;;  %v176_v10 = vsub.f32 %v490_v17, %v574_v58  ;;  %v182_v27 = vmul.f32 %v174_v3, %v174_v3  ;;  %v199_v16 = vmul.f32 4.0, %v198_v41  ;;  %v283_v7 = vmul.f32 0.5, %v561_v47 }
  0xf7   :  { %v186_v21 = vadd.f32 %v185_v1, %v179_v15  ;;  %v183_v29 = vmul.f32 %v175_v9, %v175_v9  ;;  %v284_v8 = vmul.f32 0.5, %v571_v55 }
  0xf8   :  { %v184_v31 = vmul.f32 %v176_v10, %v176_v10 }
  0xf9   :  { %v187_v26 = vadd.f32 %v186_v21, %v180_v5 }
  0xfb   :  { %v188_v28 = vadd.f32 %v187_v26, %v181_v25 }
  0xfd   :  { %v189_v30 = vadd.f32 %v188_v28, %v182_v27 }
  0xff   :  { %v190_v32 = vadd.f32 %v189_v30, %v183_v29 }
 0x101   :  { %v191_v34 = vadd.f32 %v190_v32, %v184_v31 }
 0x103   :  { %v192_v36 = vrot.slane %v191_v34, 4 }
 0x105   :  { %v193_v38 = vadd.f32 %v192_v36, %v191_v34 }
 0x107   :  { %v194_v39 = vrot.slane %v193_v38, 2 }
 0x109   :  { %v195_v40 = vadd.f32 %v194_v39, %v193_v38 }
 0x10b   :  { %v196_v42 = vrot.slane %v195_v40, 1 }
 0x10d   :  { %v197_v43 = vadd.f32 %v196_v42, %v195_v40 }
 0x10f   :  { %v200_v44 = vsub.f32 %v197_v43, %v199_v16 }
 0x111   :  { %v201_v45 = vmul.f32 0.016666668, %v200_v44 }
 0x113   :  { %v202_v46 = vmax.f32 %v201_v45, 0.0 }
 0x115   :  { %v203_v48 = vadd.f32 1e-05, %v202_v46 }
 0x117   :  { %404 = vrsqrt.f32 %v203_v48 }
 0x121   :  { %v405_v17 = vpop.eup %404 }
 0x122   :  { %v205_v49 = vmul.f32 %v405_v17, %v203_v48  ;;  %v251_v50 = vrot.slane %v405_v17, %v565_v53 }
 0x124   :  { %v253_v51 = vmul.f32 %v251_v50, %v246_v23  ;;  %v252_v52 = vmul.f32 %v251_v50, %v245_v24  ;;  %v254_v54 = vmul.f32 %v251_v50, %v247_v22  ;;  %v276_v59 = vrot.slane %v205_v49, %v565_v53 }
 0x126   :  { %v271_v57 = vadd.f32 %v549_v35, %v253_v51  ;;  %v270_v56 = vadd.f32 %v547_v33, %v252_v52  ;;  %v272_v60 = vadd.f32 %v551_v37, %v254_v54  ;;  %v285_v35 = vmul.f32 0.5, %v226_v20 }
 0x128   :  { %v278_v61 = vmul.f32 %v276_v59, %v271_v57  ;;  %v277_v62 = vmul.f32 %v276_v59, %v270_v56  ;;  %v279_v63 = vmul.f32 %v276_v59, %v272_v60 }
 0x12a   :  { %v281_v0 = vadd.f32 %v278_v61, %v574_v58  ;;  %v280_v4 = vadd.f32 %v277_v62, %v574_v58  ;;  %v282_v6 = vadd.f32 %v279_v63, %v574_v58 }
 0x12c   :  { %324 = vst [vmem:[%s638_s3 + $0x38] sm:$0xff] %v281_v0  ;;  %323 = vst [vmem:[%s638_s3 + $0x30] sm:$0xff] %v280_v4  ;;  %v286_v33 = vmul.f32 0.5, %v280_v4  ;;  %v288_v37 = vmul.f32 0.5, %v282_v6  ;;  %v287_v53 = vmul.f32 0.5, %v281_v0 }
 0x12d   :  { %325 = vst [vmem:[%s638_s3 + $0x40] sm:$0xff] %v282_v6 }
 0x12e   :  { %v289_v58 = vadd.f32 %v286_v33, %v283_v7  ;;  %v291_v47 = vadd.f32 %v288_v37, %v285_v35  ;;  %v290_v11 = vadd.f32 %v287_v53, %v284_v8 }
 0x130   :  { %292 = vst [vmem:[%s638_s3] sm:$0xff] %v289_v58  ;;  %294 = vst [vmem:[%s638_s3 + $0x10] sm:$0xff] %v291_v47 }
 0x131   :  { %293 = vst [vmem:[%s638_s3 + $0x8] sm:$0xff] %v290_v11 }

</bundles_post_ra>
